<compile_context>
chip_gen: v5e
topology: v5e:2x2
jax: 0.10.0
libtpu: 0.0.40
codegen_flags: <defaults>
</compile_context>

<pallas_src>
import math

import jax
import jax.numpy as jnp
import numpy as np
from jax.experimental import pallas as pl
from jax.experimental.pallas import tpu as pltpu


def _residual_kernel(x_ref, mx_ref, o_ref):
    # Inference branch: out = x + m(x), one fused lane-dense add + store.
    o_ref[...] = x_ref[...] + mx_ref[...]


def _residual_drop_kernel(x_ref, mx_ref, mask_ref, o_ref):
    # Training branch: out = x + m(x) * mask.
    # mask_ref is a (rows, 1) column, broadcast across the lane (channel) dim.
    o_ref[...] = x_ref[...] + mx_ref[...] * mask_ref[...]


def _choose_row_tile(rows):
    """Largest power-of-two row tile (>=8, <=512) that divides `rows`.

    512 rows x 128+ lanes keeps each step well above the ~0.35us/step pipeline
    overhead regime and near the measured HBM roofline, while typical sizes still
    give >=2 grid steps so the "parallel" axis can shard across v7x's two
    TensorCores.  Falls back to a full-array block (always legal) if rows is not
    a multiple of 8.
    """
    if rows % 8 != 0:
        return rows
    tr = 8
    while tr * 2 <= min(rows, 512) and rows % (tr * 2) == 0:
        tr *= 2
    # If we ended up with a single grid step but the array is splittable, halve
    # once so v7x megacore can still shard the work.
    if tr == rows and rows >= 16 and (rows // 2) % 8 == 0:
        tr = rows // 2
    return tr


def residual_pallas(x, mx, mask=None):
    """Residual wrapper as a fused Pallas kernel.

    out = x + mx                 if mask is None   (eval / drop == 0)
    out = x + mx * mask          if mask is (B,1,1) per-sample drop-path scale
    """
    assert x.shape == mx.shape and x.dtype == mx.dtype
    orig_shape = x.shape
    C = orig_shape[-1]
    R = math.prod(orig_shape[:-1])          # batch (and tokens) folded into rows

    x2 = x.reshape(R, C)
    mx2 = mx.reshape(R, C)

    TR = _choose_row_tile(R)
    grid = (pl.cdiv(R, TR),)
    spec2d = pl.BlockSpec((TR, C), lambda i: (i, 0))
    cparams = pltpu.CompilerParams(dimension_semantics=("parallel",))

    if mask is None:
        out = pl.pallas_call(
            _residual_kernel,
            out_shape=jax.ShapeDtypeStruct((R, C), x.dtype),
            grid=grid,
            in_specs=[spec2d, spec2d],
            out_specs=spec2d,
            compiler_params=cparams,
        )(x2, mx2)
    else:
        # Per-sample mask (B,1,1) -> per-row column (R,1), matching PyTorch's
        # broadcast of the (B,1,1) mask against a (B, N, C) activation.
        B = orig_shape[0]
        rows_per_sample = R // B
        mcol = jnp.repeat(
            mask.reshape(B).astype(x.dtype), rows_per_sample
        ).reshape(R, 1)
        mspec = pl.BlockSpec((TR, 1), lambda i: (i, 0))
        out = pl.pallas_call(
            _residual_drop_kernel,
            out_shape=jax.ShapeDtypeStruct((R, C), x.dtype),
            grid=grid,
            in_specs=[spec2d, spec2d, mspec],
            out_specs=spec2d,
            compiler_params=cparams,
        )(x2, mx2, mcol)

    return out.reshape(orig_shape)


def residual_forward(x, m_fn, *, drop=0.0, training=False, rng=None):
    """Direct mirror of Residual.forward (m_fn plays the role of self.m)."""
    mx = m_fn(x)
    if training and drop > 0.0:
        u = jax.random.uniform(rng, (x.shape[0], 1, 1), dtype=x.dtype)
        mask = (u >= drop).astype(x.dtype) / (1.0 - drop)
        return residual_pallas(x, mx, mask)
    return residual_pallas(x, mx, None)


if __name__ == "__main__":
    # Small shapes consistent with the module (LeViT-style (B, tokens, channels) input,
    # which is what the (B,1,1) drop mask broadcast implies).  C is a multiple of 128
    # so every store is a full-width lane-dense vst.
    B, N, C = 2, 256, 128
    drop = 0.3

    key = jax.random.PRNGKey(0)
    kx, kw, kb, kmask = jax.random.split(key, 4)
    x = jax.random.normal(kx, (B, N, C), jnp.float32)

    # TODO(synk): self.m is an arbitrary user-supplied nn.Module with no fixed Pallas
    # equivalent; here a small linear+tanh stand-in is evaluated in plain JAX outside
    # the kernel and its output is passed to the Residual Pallas kernel.
    Wm = 0.05 * jax.random.normal(kw, (C, C), jnp.float32)
    bm = 0.05 * jax.random.normal(kb, (C,), jnp.float32)

    def m_fn(t):
        return jnp.tanh(jnp.einsum("bnc,cd->bnd", t, Wm) + bm)

    mx = m_fn(x)

    # --- eval / drop == 0 branch:  out = x + m(x) ---
    out_eval = residual_pallas(x, mx, mask=None)
    out_eval = jax.block_until_ready(out_eval)
    ref_eval = x + mx
    if not np.allclose(np.asarray(out_eval), np.asarray(ref_eval), rtol=1e-6, atol=1e-6):
        err = float(np.max(np.abs(np.asarray(out_eval) - np.asarray(ref_eval))))
        raise AssertionError(f"eval branch mismatch, max abs err = {err}")

    # --- training / drop > 0 branch:  out = x + m(x) * mask ---
    # (mask generated with jax.random; same Bernoulli(>=drop)/(1-drop) semantics as
    #  torch.rand(...).ge_(drop).div(1-drop), reused identically by the reference)
    u = jax.random.uniform(kmask, (B, 1, 1), dtype=jnp.float32)
    mask = (u >= drop).astype(jnp.float32) / (1.0 - drop)
    out_train = residual_pallas(x, mx, mask=mask)
    out_train = jax.block_until_ready(out_train)
    ref_train = x + mx * mask
    if not np.allclose(np.asarray(out_train), np.asarray(ref_train), rtol=1e-6, atol=1e-6):
        err = float(np.max(np.abs(np.asarray(out_train) - np.asarray(ref_train))))
        raise AssertionError(f"training branch mismatch, max abs err = {err}")

    print("KERNEL_OK")
</pallas_src>

<mosaic_0001>
module attributes {stable_mosaic.version = 11 : i64} {
  func.func @_residual_kernel(%arg0: i32, %arg1: memref<256x128xf32, #tpu.memory_space<vmem>>, %arg2: memref<256x128xf32, #tpu.memory_space<vmem>>, %arg3: memref<256x128xf32, #tpu.memory_space<vmem>>) attributes {dimension_semantics = [#tpu.dimension_semantics<parallel>], iteration_bounds = array<i64: 2>, scalar_prefetch = 0 : i64, scratch_operands = 0 : i64, tpu.core_type = #tpu.core_type<tc>, window_params = [{transform_indices = @transform_0, window_bounds = array<i64: 256, 128>}, {transform_indices = @transform_1, window_bounds = array<i64: 256, 128>}, {transform_indices = @transform_2, window_bounds = array<i64: 256, 128>}]} {
    %c0 = arith.constant 0 : index
    %c0_0 = arith.constant 0 : index
    %0 = vector.load %arg1[%c0, %c0_0] : memref<256x128xf32, #tpu.memory_space<vmem>>, vector<256x128xf32>
    %c0_1 = arith.constant 0 : index
    %c0_2 = arith.constant 0 : index
    %1 = vector.load %arg2[%c0_1, %c0_2] : memref<256x128xf32, #tpu.memory_space<vmem>>, vector<256x128xf32>
    %2 = arith.addf %0, %1 : vector<256x128xf32>
    %c0_3 = arith.constant 0 : index
    %c0_4 = arith.constant 0 : index
    %3 = vector.load %arg3[%c0_3, %c0_4] : memref<256x128xf32, #tpu.memory_space<vmem>>, vector<256x128xf32>
    tpu.vector_store %arg3[%c0_3, %c0_4], %2 {strides = array<i32>} : memref<256x128xf32, #tpu.memory_space<vmem>>, vector<256x128xf32>,
    return
  }
  func.func @transform_0(%arg0: i32) -> (i32, i32) {
    %c0_i32 = arith.constant 0 : i32
    %c0_i32_0 = arith.constant 0 : i32
    return %arg0, %c0_i32 : i32, i32
  }
  func.func @transform_1(%arg0: i32) -> (i32, i32) {
    %c0_i32 = arith.constant 0 : i32
    %c0_i32_0 = arith.constant 0 : i32
    return %arg0, %c0_i32 : i32, i32
  }
  func.func @transform_2(%arg0: i32) -> (i32, i32) {
    %c0_i32 = arith.constant 0 : i32
    %c0_i32_0 = arith.constant 0 : i32
    return %arg0, %c0_i32 : i32, i32
  }
}

</mosaic_0001>

<bundles_post_ra>
// kernel: tpu_custom_call.1
= control target key start
LH: loop header
LB: loop body
LE: loop exit
PB: predicated region body
PF: predicated region fallthrough
CT: control target
= control target key end

     0   :  { %7 = vsyncpa [#allocation3], 0  ;;  %s947_s0 = inlined_call_operand.hbm [shape: f32[512,128], index: 0, kind: input, shape index: {}]   ;;  %s948_s1 = inlined_call_operand.hbm [shape: f32[512,128], index: 1, kind: input, shape index: {}]   ;;  %s949_s2 = inlined_call_operand.hbm [shape: f32[512,128], index: 2, kind: output, shape index: {}]  }
   0x1   :  { %9 = vsyncpa [#allocation3 + $0x1], 0 }
   0x2   :  { %10 = vsyncpa [#allocation6], 0 }
   0x3   :  { %12 = vsyncpa [#allocation6 + $0x1], 0 }
   0x4   :  { %13 = vsyncpa [#allocation4], 0 }
   0x5   :  { %15 = vsyncpa [#allocation4 + $0x1], 0  ;;  %s676_s9 = smov 0   ;;  %s678_s10 = smov 0  }
   0x6   :  { %s680_s11 = smov 0   ;;  %s682_s12 = smov 0  }
   0x7 LB: > { %s697_s13 = sadd.s32 4294967295, %s655_s12   ;;  %s449_s14 = sadd.s32 4294967294, %s655_s12   ;;  %s655_s12 = sphi %s682_s12, %s960_s12   ;;  %s651_s11 = sphi %s680_s11, %s959_s11   ;;  %s647_s10 = sphi %s678_s10, %s958_s10   ;;  %s643_s9 = sphi %s676_s9, %s957_s9  }
   0x8   : > { %s701_s15 = sadd.s32 1, %s655_s12   ;;  %s28_s16 = sadd.s32 1, %s651_s11 }
   0x9   : > { %s25_s17 = ssub.s32 %s655_s12, %s701_s15  ;;  %p35_p0 = scmp.ne.s32.totalorder %s651_s11, %s647_s10 }
   0xa   : > { %p26_p1 = scmp.eq.s32.totalorder %s25_s17, 0  ;;  %p36_p2 = scmp.eq.s32.totalorder %s655_s12, 0 }
   0xb   : > { %p41_p3 = scmp.ne.s32.totalorder %s647_s10, %s643_s9  ;;  %p42_p4 = scmp.eq.s32.totalorder %s697_s13, 0 }
   0xc   : > { %s713_s18 = scalar_select %p26_p1, %s651_s11, %s28_s16  }
   0xd   : > { %p715_p5 = por %p36_p2, %p35_p0  ;;  %p719_p6 = por %p42_p4, %p41_p3 }
   0xe   : > { %p91_p7 = scmp.eq.s32.totalorder %s697_s13, 1  ;;  %p97_p8 = scmp.eq.s32.totalorder %s449_s14, 1 }
   0xf   : > { %p487_p10 = scmp.lt.s32.totalorder %s655_s12, 2  ;;  %s735_s23 = sand.u32 1, %s651_s11  }
  0x10   : > { %p726_p11 = por %p91_p7, %p35_p0  ;;  %p730_p12 = por %p97_p8, %p41_p3 }
  0x11   : > { %s467_s24 = sshll.u32 %s655_s12, 8  ;;  %s452_s25 = sshll.u32 %s735_s23, 8 }
  0x12   : > { %s126_s28 = scalar_lea.hbm %s947_s0, %s467_s24  ;;  %s121_s30 = scalar_lea.vmem [#allocation2], %s452_s25 }
  0x13   : > { %s127_s29 = sshll.u32 %s126_s28, 4  ;;  %s129_s3 = sshll.u32 %s121_s30, 4  ;;  %s128_s29 = int_to_ptr.hbm [resolvable:$true] %s127_s29  ;;  %s130_s3 = int_to_ptr.vmem [resolvable:$true] %s129_s3 }
  0x14   : > { %p748_p13 = pnand %p487_p10, %p715_p5  ;;  %p458_p0 = scmp.ge.s32.totalorder %s655_s12, 1 }
  0x15   : > { %p159_p1 = scmp.lt.s32.totalorder %s655_s12, 3  ;;  %s118_s5 = scalar_lea.sflag [#allocation3], %s735_s23 }
  0x16   : > { %s525_s6 = sshra.s32 %s128_s29, 4  ;;  %p529_p3 = pneg %p748_p13  ;;  %s526_s6 = int_to_ptr.hbm [resolvable:$true] %s525_s6 }
  0x17   : > { %s527_s7 = scalar_lea.hbm %s526_s6, 256  ;;  %s532_s16 = scalar_lea.hbm %s947_s0, 512 }
  0x18   : > { %p528_p2 = scmp.ne.s32.totalorder %s526_s6, %s527_s7  ;;  %p533_p5 = scmp.lt.s32.totalorder %s526_s6, %s947_s0 }
  0x19   : > { %p534_p8 = scmp.lt.s32.totalorder %s532_s16, %s527_s7 }
  0x1a   : > { %p530_p4 = pnand %p529_p3, %p528_p2 }
  0x1b   : > { %p535_p10 = por %p534_p8, %p533_p5 }
  0x1c   : > { %p531_p7 = pneg %p530_p4 }
  0x1e   : > { %p536_p9 = pnand %p535_p10, %p531_p7 }
  0x20   : > { %539 = shalt.err (!%p536_p9)
}
  0x21   : > { %s657_s26 = smov 128   ;;  %s658_s27 = smov 8  }
  0x22   : > { %479 = dma.hbm_to_vmem [thread:$0]  (!%p748_p13), %s128_s29, 4096, %s130_s3, %s118_s5, %s657_s26, %s657_s26, %s658_s27  }
  0x23   : > { %p772_p2 = pnand %p458_p0, %p159_p1  ;;  %s148_s7 = scalar_lea.hbm %s948_s1, %s467_s24 }
  0x24   : > { %s149_s8 = sshll.u32 %s148_s7, 4  ;;  %s143_s14 = scalar_lea.vmem [#allocation5], %s452_s25  ;;  %s150_s8 = int_to_ptr.hbm [resolvable:$true] %s149_s8 }
  0x25   : > { %s151_s16 = sshll.u32 %s143_s14, 4  ;;  %s140_s17 = scalar_lea.sflag [#allocation6], %s735_s23  ;;  %s152_s16 = int_to_ptr.vmem [resolvable:$true] %s151_s16 }
  0x26   : > { %s555_s19 = sshra.s32 %s150_s8, 4  ;;  %s562_s30 = scalar_lea.hbm %s948_s1, 512  ;;  %s556_s19 = int_to_ptr.hbm [resolvable:$true] %s555_s19 }
  0x27   : > { %s557_s29 = scalar_lea.hbm %s556_s19, 256  ;;  %p563_p4 = scmp.lt.s32.totalorder %s556_s19, %s948_s1 }
  0x28   : > { %p558_p9 = scmp.ne.s32.totalorder %s556_s19, %s557_s29  ;;  %p564_p7 = scmp.lt.s32.totalorder %s562_s30, %s557_s29 }
  0x2a   : > { %p560_p0 = pnand %p558_p9, %p529_p3  ;;  %p565_p5 = por %p564_p7, %p563_p4 }
  0x2c   : > { %p561_p1 = pneg %p560_p0 }
  0x2e   : > { %p566_p8 = pnand %p565_p5, %p561_p1 }
  0x30   : > { %569 = shalt.err (!%p566_p8)
}
  0x31   : > { %482 = dma.hbm_to_vmem [thread:$0]  (!%p748_p13), %s150_s8, 4096, %s152_s16, %s140_s17, %s657_s26, %s657_s26, %s658_s27  }
  0x32   : > { %163 = sbr.rel (%p772_p2) target bundleno = 97 (0x61), region = 28  ;;  %s798_s23 = sand.u32 (!%p772_p2), 1, %s647_s10  }
  0x33   : > { %s459_s25 = sshll.u32 (!%p772_p2), %s798_s23, 8  ;;  %s166_s7 = scalar_lea.sflag (!%p772_p2), [#allocation3], %s798_s23 }
  0x34   : > { %s802_s14 = scalar_lea.vmem (!%p772_p2), [#allocation2], %s459_s25 }
  0x37   : > { %630 = dma.done.wait (%p719_p6), %s166_s7, 4096  }
  0x38   : > { %632 = vsyncadd (%p719_p6), %s166_s7, 4294963200  ;;  %s176_s4 = scalar_lea.sflag [#allocation6], %s798_s23  ;;  %s809_s26 = scalar_lea.vmem [#allocation5], %s459_s25 }
  0x39   : > { %634 = dma.done.wait (%p719_p6), %s176_s4, 4096  }
  0x3a   : > { %636 = vsyncadd (%p719_p6), %s176_s4, 4294963200  ;;  %v209_v0 = vld [vmem:[%s802_s14] sm:$0xff]  ;;  %v210_v2 = vld [vmem:[%s802_s14 + $0x8] sm:$0xff]  ;;  %s824_s20 = scalar_lea.vmem [#allocation7], %s459_s25  ;;  %s469_s27 = sshll.u32 %s697_s13, 8 }
  0x3b   : > { %v241_v1 = vld [vmem:[%s809_s26] sm:$0xff]  ;;  %v242_v4 = vld [vmem:[%s809_s26 + $0x8] sm:$0xff]  ;;  %v211_v5 = vld [vmem:[%s802_s14 + $0x10] sm:$0xff]  ;;  %s349_s8 = scalar_lea.hbm %s949_s2, %s469_s27  ;;  %s350_s16 = sshll.u32 %s824_s20, 4  ;;  %s351_s16 = int_to_ptr.vmem [resolvable:$true] %s350_s16 }
  0x3c   : > { %v273_v3 = vadd.f32 %v241_v1, %v209_v0  ;;  %v243_v6 = vld [vmem:[%s809_s26 + $0x10] sm:$0xff]  ;;  %v274_v7 = vadd.f32 %v242_v4, %v210_v2  ;;  %v212_v9 = vld [vmem:[%s802_s14 + $0x18] sm:$0xff]  ;;  %v213_v11 = vld [vmem:[%s802_s14 + $0x20] sm:$0xff]  ;;  %s352_s17 = sshll.u32 %s349_s8, 4  ;;  %s338_s19 = scalar_lea.sflag [#allocation4], %s798_s23  ;;  %s353_s17 = int_to_ptr.hbm [resolvable:$true] %s352_s17 }
  0x3d   : > { %v275_v8 = vadd.f32 %v243_v6, %v211_v5  ;;  %v244_v10 = vld [vmem:[%s809_s26 + $0x18] sm:$0xff]  ;;  %v245_v13 = vld [vmem:[%s809_s26 + $0x20] sm:$0xff]  ;;  %v214_v14 = vld [vmem:[%s802_s14 + $0x28] sm:$0xff]  ;;  %s599_s29 = sshra.s32 %s353_s17, 4  ;;  %s605_s24 = scalar_lea.hbm %s949_s2, 512  ;;  %s600_s29 = int_to_ptr.hbm [resolvable:$true] %s599_s29 }
  0x3e   : > { %305 = vst [vmem:[%s824_s20] sm:$0xff] %v273_v3  ;;  %v276_v12 = vadd.f32 %v244_v10, %v212_v9  ;;  %v246_v15 = vld [vmem:[%s809_s26 + $0x28] sm:$0xff]  ;;  %v277_v16 = vadd.f32 %v245_v13, %v213_v11  ;;  %v215_v18 = vld [vmem:[%s802_s14 + $0x30] sm:$0xff]  ;;  %v216_v20 = vld [vmem:[%s802_s14 + $0x38] sm:$0xff]  ;;  %s601_s3 = scalar_lea.hbm %s600_s29, 256  ;;  %p606_p10 = scmp.lt.s32.totalorder %s600_s29, %s949_s2 }
  0x3f   : > { %306 = vst [vmem:[%s824_s20 + $0x8] sm:$0xff] %v274_v7  ;;  %v278_v17 = vadd.f32 %v246_v15, %v214_v14  ;;  %v247_v19 = vld [vmem:[%s809_s26 + $0x30] sm:$0xff]  ;;  %v248_v22 = vld [vmem:[%s809_s26 + $0x38] sm:$0xff]  ;;  %v217_v23 = vld [vmem:[%s802_s14 + $0x40] sm:$0xff]  ;;  %p602_p6 = scmp.ne.s32.totalorder %s600_s29, %s601_s3  ;;  %p607_p2 = scmp.lt.s32.totalorder %s605_s24, %s601_s3 }
  0x40   : > { %307 = vst [vmem:[%s824_s20 + $0x10] sm:$0xff] %v275_v8  ;;  %v279_v21 = vadd.f32 %v247_v19, %v215_v18  ;;  %v249_v24 = vld [vmem:[%s809_s26 + $0x40] sm:$0xff]  ;;  %v280_v25 = vadd.f32 %v248_v22, %v216_v20  ;;  %v218_v26 = vld [vmem:[%s802_s14 + $0x48] sm:$0xff]  ;;  %v219_v28 = vld [vmem:[%s802_s14 + $0x50] sm:$0xff] }
  0x41   : > { %308 = vst [vmem:[%s824_s20 + $0x18] sm:$0xff] %v276_v12  ;;  %v250_v27 = vld [vmem:[%s809_s26 + $0x48] sm:$0xff]  ;;  %v281_v29 = vadd.f32 %v249_v24, %v217_v23  ;;  %v251_v30 = vld [vmem:[%s809_s26 + $0x50] sm:$0xff]  ;;  %v220_v31 = vld [vmem:[%s802_s14 + $0x58] sm:$0xff]  ;;  %p603_p13 = pnand %p602_p6, %p726_p11  ;;  %p608_p9 = por %p607_p2, %p606_p10 }
  0x42   : > { %309 = vst [vmem:[%s824_s20 + $0x20] sm:$0xff] %v277_v16  ;;  %v252_v32 = vld [vmem:[%s809_s26 + $0x58] sm:$0xff]  ;;  %v282_v33 = vadd.f32 %v250_v27, %v218_v26  ;;  %v221_v34 = vld [vmem:[%s802_s14 + $0x60] sm:$0xff]  ;;  %v283_v36 = vadd.f32 %v251_v30, %v219_v28  ;;  %v222_v37 = vld [vmem:[%s802_s14 + $0x68] sm:$0xff] }
  0x43   : > { %310 = vst [vmem:[%s824_s20 + $0x28] sm:$0xff] %v278_v17  ;;  %v253_v35 = vld [vmem:[%s809_s26 + $0x60] sm:$0xff]  ;;  %v254_v38 = vld [vmem:[%s809_s26 + $0x68] sm:$0xff]  ;;  %v284_v39 = vadd.f32 %v252_v32, %v220_v31  ;;  %v223_v40 = vld [vmem:[%s802_s14 + $0x70] sm:$0xff]  ;;  %p604_p3 = pneg %p603_p13 }
  0x44   : > { %311 = vst [vmem:[%s824_s20 + $0x30] sm:$0xff] %v279_v21  ;;  %v255_v41 = vld [vmem:[%s809_s26 + $0x70] sm:$0xff]  ;;  %v285_v42 = vadd.f32 %v253_v35, %v221_v34  ;;  %v224_v43 = vld [vmem:[%s802_s14 + $0x78] sm:$0xff]  ;;  %v286_v45 = vadd.f32 %v254_v38, %v222_v37  ;;  %v225_v46 = vld [vmem:[%s802_s14 + $0x80] sm:$0xff] }
  0x45   : > { %312 = vst [vmem:[%s824_s20 + $0x38] sm:$0xff] %v280_v25  ;;  %v256_v44 = vld [vmem:[%s809_s26 + $0x78] sm:$0xff]  ;;  %v257_v47 = vld [vmem:[%s809_s26 + $0x80] sm:$0xff]  ;;  %v287_v48 = vadd.f32 %v255_v41, %v223_v40  ;;  %v226_v49 = vld [vmem:[%s802_s14 + $0x88] sm:$0xff]  ;;  %p609_p0 = pnand %p608_p9, %p604_p3 }
  0x46   : > { %313 = vst [vmem:[%s824_s20 + $0x40] sm:$0xff] %v281_v29  ;;  %v258_v50 = vld [vmem:[%s809_s26 + $0x88] sm:$0xff]  ;;  %v288_v51 = vadd.f32 %v256_v44, %v224_v43  ;;  %v227_v52 = vld [vmem:[%s802_s14 + $0x90] sm:$0xff]  ;;  %v289_v54 = vadd.f32 %v257_v47, %v225_v46  ;;  %v228_v55 = vld [vmem:[%s802_s14 + $0x98] sm:$0xff] }
  0x47   : > { %314 = vst [vmem:[%s824_s20 + $0x48] sm:$0xff] %v282_v33  ;;  %v259_v53 = vld [vmem:[%s809_s26 + $0x90] sm:$0xff]  ;;  %v260_v56 = vld [vmem:[%s809_s26 + $0x98] sm:$0xff]  ;;  %v290_v57 = vadd.f32 %v258_v50, %v226_v49  ;;  %v229_v58 = vld [vmem:[%s802_s14 + $0xa0] sm:$0xff] }
  0x48   : > { %315 = vst [vmem:[%s824_s20 + $0x50] sm:$0xff] %v283_v36  ;;  %v261_v59 = vld [vmem:[%s809_s26 + $0xa0] sm:$0xff]  ;;  %v291_v60 = vadd.f32 %v259_v53, %v227_v52  ;;  %v230_v61 = vld [vmem:[%s802_s14 + $0xa8] sm:$0xff]  ;;  %v292_v63 = vadd.f32 %v260_v56, %v228_v55  ;;  %v231_v0 = vld [vmem:[%s802_s14 + $0xb0] sm:$0xff] }
  0x49   : > { %316 = vst [vmem:[%s824_s20 + $0x58] sm:$0xff] %v284_v39  ;;  %v262_v62 = vld [vmem:[%s809_s26 + $0xa8] sm:$0xff]  ;;  %v263_v1 = vld [vmem:[%s809_s26 + $0xb0] sm:$0xff]  ;;  %v293_v2 = vadd.f32 %v261_v59, %v229_v58  ;;  %v232_v3 = vld [vmem:[%s802_s14 + $0xb8] sm:$0xff] }
  0x4a   : > { %317 = vst [vmem:[%s824_s20 + $0x60] sm:$0xff] %v285_v42  ;;  %v264_v4 = vld [vmem:[%s809_s26 + $0xb8] sm:$0xff]  ;;  %v294_v5 = vadd.f32 %v262_v62, %v230_v61  ;;  %v233_v6 = vld [vmem:[%s802_s14 + $0xc0] sm:$0xff]  ;;  %v295_v8 = vadd.f32 %v263_v1, %v231_v0  ;;  %v234_v9 = vld [vmem:[%s802_s14 + $0xc8] sm:$0xff] }
  0x4b   : > { %318 = vst [vmem:[%s824_s20 + $0x68] sm:$0xff] %v286_v45  ;;  %v265_v7 = vld [vmem:[%s809_s26 + $0xc0] sm:$0xff]  ;;  %v266_v10 = vld [vmem:[%s809_s26 + $0xc8] sm:$0xff]  ;;  %v296_v11 = vadd.f32 %v264_v4, %v232_v3  ;;  %v235_v12 = vld [vmem:[%s802_s14 + $0xd0] sm:$0xff] }
  0x4c   : > { %319 = vst [vmem:[%s824_s20 + $0x70] sm:$0xff] %v287_v48  ;;  %v267_v13 = vld [vmem:[%s809_s26 + $0xd0] sm:$0xff]  ;;  %v297_v14 = vadd.f32 %v265_v7, %v233_v6  ;;  %v236_v15 = vld [vmem:[%s802_s14 + $0xd8] sm:$0xff]  ;;  %v298_v17 = vadd.f32 %v266_v10, %v234_v9  ;;  %v237_v18 = vld [vmem:[%s802_s14 + $0xe0] sm:$0xff] }
  0x4d   : > { %320 = vst [vmem:[%s824_s20 + $0x78] sm:$0xff] %v288_v51  ;;  %v268_v16 = vld [vmem:[%s809_s26 + $0xd8] sm:$0xff]  ;;  %v269_v19 = vld [vmem:[%s809_s26 + $0xe0] sm:$0xff]  ;;  %v299_v20 = vadd.f32 %v267_v13, %v235_v12  ;;  %v238_v21 = vld [vmem:[%s802_s14 + $0xe8] sm:$0xff] }
  0x4e   : > { %321 = vst [vmem:[%s824_s20 + $0x80] sm:$0xff] %v289_v54  ;;  %v270_v22 = vld [vmem:[%s809_s26 + $0xe8] sm:$0xff]  ;;  %v300_v23 = vadd.f32 %v268_v16, %v236_v15  ;;  %v239_v24 = vld [vmem:[%s802_s14 + $0xf0] sm:$0xff]  ;;  %v301_v26 = vadd.f32 %v269_v19, %v237_v18  ;;  %v240_v27 = vld [vmem:[%s802_s14 + $0xf8] sm:$0xff] }
  0x4f   : > { %322 = vst [vmem:[%s824_s20 + $0x88] sm:$0xff] %v290_v57  ;;  %v271_v25 = vld [vmem:[%s809_s26 + $0xf0] sm:$0xff]  ;;  %v272_v28 = vld [vmem:[%s809_s26 + $0xf8] sm:$0xff]  ;;  %v302_v29 = vadd.f32 %v270_v22, %v238_v21 }
  0x50   : > { %323 = vst [vmem:[%s824_s20 + $0x90] sm:$0xff] %v291_v60  ;;  %v303_v30 = vadd.f32 %v271_v25, %v239_v24  ;;  %v304_v31 = vadd.f32 %v272_v28, %v240_v27 }
  0x51   : > { %324 = vst [vmem:[%s824_s20 + $0x98] sm:$0xff] %v292_v63 }
  0x52   : > { %325 = vst [vmem:[%s824_s20 + $0xa0] sm:$0xff] %v293_v2 }
  0x53   : > { %326 = vst [vmem:[%s824_s20 + $0xa8] sm:$0xff] %v294_v5 }
  0x54   : > { %327 = vst [vmem:[%s824_s20 + $0xb0] sm:$0xff] %v295_v8 }
  0x55   : > { %328 = vst [vmem:[%s824_s20 + $0xb8] sm:$0xff] %v296_v11 }
  0x56   : > { %329 = vst [vmem:[%s824_s20 + $0xc0] sm:$0xff] %v297_v14 }
  0x57   : > { %330 = vst [vmem:[%s824_s20 + $0xc8] sm:$0xff] %v298_v17 }
  0x58   : > { %331 = vst [vmem:[%s824_s20 + $0xd0] sm:$0xff] %v299_v20 }
  0x59   : > { %332 = vst [vmem:[%s824_s20 + $0xd8] sm:$0xff] %v300_v23 }
  0x5a   : > { %333 = vst [vmem:[%s824_s20 + $0xe0] sm:$0xff] %v301_v26 }
  0x5b   : > { %334 = vst [vmem:[%s824_s20 + $0xe8] sm:$0xff] %v302_v29 }
  0x5c   : > { %335 = vst [vmem:[%s824_s20 + $0xf0] sm:$0xff] %v303_v30 }
  0x5d   : > { %336 = vst [vmem:[%s824_s20 + $0xf8] sm:$0xff] %v304_v31 }
  0x5e   : > { %612 = shalt.err (!%p609_p0)
}
  0x5f   : > { %s659_s23 = smov 128   ;;  %s660_s7 = smov 8  }
  0x60   : > { %474 = dma.vmem_to_hbm [thread:$0]  (%p726_p11), %s351_s16, 4096, %s353_s17, %s338_s19, %s659_s23, %s659_s23, %s660_s7  }
  0x61 PF: > { %s367_s14 = sand.u32 1, %s643_s9   ;;  %p956_p1 = scmp.ge.s32.totalorder %s655_s12, 2 }
  0x62   : > { %s368_s4 = scalar_lea.sflag [#allocation4], %s367_s14 }
  0x63   : > { %p484_p4 = pnand %p956_p1, %p730_p12 }
  0x65   : > { %p485_p7 = pneg %p484_p4 }
  0x67   : > { %638 = dma.done.wait (%p485_p7), %s368_s4, 4096  }
  0x68   : > { %640 = vsyncadd (%p485_p7), %s368_s4, 4294963200  ;;  %p18_p5 = scmp.ge.s32.totalorder %s701_s15, 4   ;;  %s957_s9 = smov %s647_s10 }
  0x69   : > { %s958_s10 = smov %s651_s11  ;;  %s959_s11 = smov %s713_s18 }
  0x6a   : > { %s960_s12 = smov %s701_s15  ;;  %20 = sbr.rel (!%p18_p5) target bundleno = 7 (0x7), region = 86 }
  0x6f   :  { %374 = vsyncpa [#allocation3], 1 }
  0x70   :  { %376 = vsyncpa [#allocation3 + $0x1], 1 }
  0x71   :  { %377 = vsyncpa [#allocation6], 1 }
  0x72   :  { %379 = vsyncpa [#allocation6 + $0x1], 1 }
  0x73   :  { %380 = vsyncpa [#allocation4], 1 }
  0x74   :  { %382 = vsyncpa [#allocation4 + $0x1], 1 }

</bundles_post_ra>
